<compile_context>
chip_gen: v7x
topology: tpu7x:2x2x1
jax: 0.10.0
libtpu: 0.0.40
codegen_flags: <defaults>
</compile_context>

<pallas_src>
import functools

import jax
import jax.numpy as jnp
import numpy as np
from jax import lax
from jax.experimental import pallas as pl
from jax.experimental.pallas import tpu as pltpu

_VMEM_LIMIT_BYTES = 48 * 1024 * 1024   # explicit scoped-VMEM limit (headroom on v7x's 64 MiB)
_VMEM_STEP_BUDGET = 24 * 1024 * 1024   # target per-step footprint incl. double buffering


# -----------------------------------------------------------------------------
# channel_shuffle (exact port of the PyTorch helper) — pure glue.
# -----------------------------------------------------------------------------
def channel_shuffle(x, groups: int = 2):
    b, c, h, w = x.shape
    assert c % groups == 0
    gc = c // groups
    out = x.reshape(b * gc, groups, h * w)
    out = jnp.transpose(out, (1, 0, 2))
    out = out.reshape(2, b, gc, h, w)
    return out[0], out[1]


# -----------------------------------------------------------------------------
# pltpu.roll convention probe (cached): does pltpu.roll match jnp.roll
# (out[i] = x[i - shift])?  Called eagerly, outside jit.
# -----------------------------------------------------------------------------
@functools.lru_cache(maxsize=None)
def _roll_matches_jnp() -> bool:
    def k(x_ref, o_ref):
        o_ref[...] = pltpu.roll(x_ref[...], 1, 1)

    x = jnp.tile(lax.iota(jnp.float32, 128)[None, :], (8, 1))
    y = pl.pallas_call(k, out_shape=jax.ShapeDtypeStruct((8, 128), jnp.float32))(x)
    return bool(jax.device_get(y)[0, 0] == 127.0)


def _shift_amount(d: int, n: int, roll_like_jnp: bool) -> int:
    """Roll amount s.t. out[i] = x[(i + d) % n]."""
    return (-d) % n if roll_like_jnp else d % n


def _tap(src, d: int, n: int, roll_like_jnp: bool):
    """t with t[:, i] = src[:, (i + d) % n] (wrapped entries masked by the caller)."""
    if d % n == 0:
        return src
    return pltpu.roll(src, _shift_amount(d, n, roll_like_jnp), 1)


def _mm_relu(w_ref, b_ref, act):
    # bf16 MXU operands (bf16 x bf16 products are exact in f32), f32 accumulation,
    # folded-BN bias add and ReLU on the f32 result.
    y = jnp.dot(w_ref[...], act.astype(jnp.bfloat16),
                preferred_element_type=jnp.float32)
    return jnp.maximum(y + b_ref[...], 0.0)


# -----------------------------------------------------------------------------
# Stride-1 fused kernel: 1x1+BN+ReLU -> 3x3 depthwise+BN -> 1x1+BN+ReLU.
# Operates on a (Cin, N) block, N = batch_chunk*H*W on lanes.
# -----------------------------------------------------------------------------
def _unit_s1_kernel(x_ref, rc_ref, w1_ref, b1_ref, wdw_ref, bdw_ref,
                    w3_ref, b3_ref, o_ref, *, img_h, img_w, roll_like_jnp):
    n = x_ref.shape[1]

    # 1x1 conv (+folded BN) + ReLU  -> (hidden, N) f32, lane-dense.
    y1 = _mm_relu(w1_ref, b1_ref, x_ref[...])

    # Boundary masks generated in-kernel from the tiny (2, N) row/col index vector
    # (replaces the old (9, N) f32 HBM mask stream).
    rc = rc_ref[...]
    hh, ww = rc[0:1, :], rc[1:2, :]
    row_m = {-1: (hh > 0).astype(jnp.float32), 0: None,
             1: (hh < img_h - 1).astype(jnp.float32)}
    col_m = {-1: (ww > 0).astype(jnp.float32), 0: None,
             1: (ww < img_w - 1).astype(jnp.float32)}

    # 3x3 depthwise, stride 1, pad 1 (+folded BN): unmasked center tap initializes the
    # accumulator; the 8 remaining taps are rolls (XLU) * per-channel weight * mask.
    wdw = wdw_ref[...]                       # (hidden, 9) f32, hoisted once
    acc = y1 * wdw[:, 4:5]                   # center tap (kh=kw=1): no roll, no mask
    for kh in range(3):
        for kw in range(3):
            if kh == 1 and kw == 1:
                continue
            dh, dw = kh - 1, kw - 1
            k = 3 * kh + kw
            tap = _tap(y1, dh * img_w + dw, n, roll_like_jnp)
            t = tap * wdw[:, k:k + 1]
            rm, cm = row_m[dh], col_m[dw]
            m = rm if cm is None else (cm if rm is None else rm * cm)
            acc = acc + t * m
    y2 = acc + bdw_ref[...]

    # 1x1 conv (+folded BN) + ReLU -> bf16, full-lane unmasked store.
    o_ref[...] = _mm_relu(w3_ref, b3_ref, y2).astype(o_ref.dtype)


# -----------------------------------------------------------------------------
# Stride-2 fused kernel: branch_proj and branch_main, phase-decomposed input.
# xph_ref layout: (2, 2, Cin, N) with xph[p, q, c, (b,ho,wo)] = x[b, c, 2ho+p, 2wo+q].
# -----------------------------------------------------------------------------
def _unit_s2_kernel(xph_ref, rc_ref,
                    wdwp_ref, bdwp_ref, wp1_ref, bp1_ref,
                    w1_ref, b1_ref, wdwm_ref, bdwm_ref, w3_ref, b3_ref,
                    o_ref, *, out_w, cin, roll_like_jnp):
    n = o_ref.shape[1]

    # Stride-2 / pad-1 only needs the top/left boundary masks.
    rc = rc_ref[...]
    ho, wo = rc[0:1, :], rc[1:2, :]
    m_top = (ho > 0).astype(jnp.float32)     # needed when kh == 0
    m_left = (wo > 0).astype(jnp.float32)    # needed when kw == 0
    m_tl = m_top * m_left                    # corner (kh == 0 and kw == 0)

    # Load the four spatial phases of x once (bf16 in VMEM).
    xph = [[xph_ref[p, q, :, :] for q in range(2)] for p in range(2)]

    # branch_main first 1x1+BN+ReLU is pointwise -> evaluate per phase.
    # TODO(synk): fuse the four per-phase 1x1s into one (hidden,cin)x(cin,4N) matmul
    # once the phase axis can stay lane-contiguous per batch chunk.
    yph = [[_mm_relu(w1_ref, b1_ref, xph[p][q]) for q in range(2)] for p in range(2)]

    def dw_stride2(src, wdw_ref, bdw_ref):
        # out[c,(b,ho,wo)] = sum_{kh,kw} w[c,3kh+kw] * in[c, b, 2ho+kh-1, 2wo+kw-1]
        # tap (kh,kw) lives on phase ((kh+1)%2, (kw+1)%2), rolled by -Wo / -1 when
        # kh==0 / kw==0 and masked at ho==0 / wo==0.  Depthwise math stays f32.
        src = [[s.astype(jnp.float32) for s in row] for row in src]
        wdw = wdw_ref[...]                   # (C, 9) f32, hoisted once
        acc = src[0][0] * wdw[:, 4:5]        # tap (kh=1,kw=1): phase (0,0), no roll/mask
        for kh in range(3):
            p = (kh + 1) % 2
            dh = -1 if kh == 0 else 0
            for kw in range(3):
                if kh == 1 and kw == 1:
                    continue
                q = (kw + 1) % 2
                dw = -1 if kw == 0 else 0
                k = 3 * kh + kw
                tap = _tap(src[p][q], dh * out_w + dw, n, roll_like_jnp)
                t = tap * wdw[:, k:k + 1]
                if kh == 0 and kw == 0:
                    t = t * m_tl
                elif kh == 0:
                    t = t * m_top
                elif kw == 0:
                    t = t * m_left
                acc = acc + t
        return acc + bdw_ref[...]

    # branch_main: depthwise(stride 2)+BN -> 1x1+BN+ReLU
    main_out = _mm_relu(w3_ref, b3_ref, dw_stride2(yph, wdwm_ref, bdwm_ref))
    # branch_proj: depthwise(stride 2)+BN -> 1x1+BN+ReLU
    proj_out = _mm_relu(wp1_ref, bp1_ref, dw_stride2(xph, wdwp_ref, bdwp_ref))

    # torch.cat([proj, main], channel) as two disjoint, 8-sublane-aligned slice
    # stores (cin is a multiple of 8), both lane-dense, in bf16.
    o_ref[:cin, :] = proj_out.astype(o_ref.dtype)
    o_ref[cin:, :] = main_out.astype(o_ref.dtype)


# -----------------------------------------------------------------------------
# Parameter folding (conv + eval-mode BN), index vectors, tiling heuristic.
# -----------------------------------------------------------------------------
def _fold_1x1(w, scale, shift):
    # PyTorch 1x1 conv weight (O, I) + BN -> bf16 matmul weight (O, I), f32 bias (O, 1).
    return ((w * scale[:, None]).astype(jnp.bfloat16),
            shift[:, None].astype(jnp.float32))


def _fold_dw(w, scale, shift):
    # PyTorch depthwise weight (C, 1, 3, 3) + BN -> f32 taps (C, 9), f32 bias (C, 1).
    c = w.shape[0]
    return ((w[:, 0].reshape(c, 9) * scale[:, None]).astype(jnp.float32),
            shift[:, None].astype(jnp.float32))


def _rowcol_index(h, w, reps):
    """(2, reps*h*w) f32 per-pixel (row, col) indices, tiled per image in a chunk."""
    hh = jnp.repeat(jnp.arange(h, dtype=jnp.float32), w)
    ww = jnp.tile(jnp.arange(w, dtype=jnp.float32), h)
    return jnp.tile(jnp.stack([hh, ww]), (1, reps))


def _full_spec(shape):
    return pl.BlockSpec(shape, lambda *_: (0,) * len(shape))


def _pick_batch_chunk(batch, spatial, per_lane_bytes):
    """Largest batch chunk that (a) keeps the lane width a multiple of 128 (or spans
    the whole batch), (b) fits the per-step VMEM budget, (c) leaves >=2 grid steps
    when possible (v7x dual-TensorCore sharding + DMA/compute pipelining)."""
    best_key, best_d = None, batch
    for d in range(1, batch + 1):
        if batch % d:
            continue
        nc = d * spatial
        if nc % 128 != 0 and d != batch:
            continue  # would violate the Mosaic 128-lane block constraint
        key = (nc * per_lane_bytes <= _VMEM_STEP_BUDGET,   # fits per-step VMEM budget
               batch // d >= 2,                            # >=2 grid steps
               nc % 128 == 0,                              # lane-dense stores
               nc)                                         # then biggest block
        if best_key is None or key > best_key:
            best_key, best_d = key, d
    return best_d


def _cost(flops, bytes_accessed):
    return pl.CostEstimate(flops=int(flops), transcendentals=0,
                           bytes_accessed=int(bytes_accessed))


# -----------------------------------------------------------------------------
# Wrappers.
# -----------------------------------------------------------------------------
def shufflenet_v2_unit_stride1(x_nchw, raw, *, batch_chunk=None):
    B, C, H, W = x_nchw.shape
    cin = C // 2
    hidden = raw["m1_w"].shape[0]
    cmain = raw["m3_w"].shape[0]
    spatial = H * W
    if batch_chunk is None:
        per_lane = 4 * cin + 4 * cmain + 12 * hidden + 8   # rough bytes/lane per step
        bc = _pick_batch_chunk(B, spatial, per_lane)
    else:
        bc = batch_chunk
    assert B % bc == 0
    nc = bc * spatial
    assert nc % 128 == 0 or bc == B, "lane width must be 128-aligned or span the batch"
    roll_like_jnp = _roll_matches_jnp()

    # channel shuffle + NCHW -> bf16 (C, B*H*W) lane-dense layout (glue).  The proj
    # half bypasses the kernel entirely (wrapper-side concat).
    proj, main_in = channel_shuffle(x_nchw)
    x_flat = jnp.transpose(main_in, (1, 0, 2, 3)).reshape(cin, B * spatial)
    x_flat = x_flat.astype(jnp.bfloat16)

    w1, b1 = _fold_1x1(raw["m1_w"], raw["m1_scale"], raw["m1_shift"])
    wdw, bdw = _fold_dw(raw["m2_w"], raw["m2_scale"], raw["m2_shift"])
    w3, b3 = _fold_1x1(raw["m3_w"], raw["m3_scale"], raw["m3_shift"])
    rc = _rowcol_index(H, W, bc)

    flops = 2 * B * spatial * (cin * hidden + hidden * cmain + 9 * hidden)
    bytes_acc = (2 * B * spatial * (cin + cmain) + 8 * nc
                 + 2 * (w1.size + w3.size) + 4 * (wdw.size + 3 * hidden + cmain))

    kernel = functools.partial(_unit_s1_kernel, img_h=H, img_w=W,
                               roll_like_jnp=roll_like_jnp)
    main_flat = pl.pallas_call(
        kernel,
        out_shape=jax.ShapeDtypeStruct((cmain, B * spatial), jnp.bfloat16),
        grid_spec=pltpu.PrefetchScalarGridSpec(
            num_scalar_prefetch=0,
            grid=(B // bc,),
            in_specs=[
                pl.BlockSpec((cin, nc), lambda i: (0, i)),
                _full_spec(rc.shape),
                _full_spec(w1.shape), _full_spec(b1.shape),
                _full_spec(wdw.shape), _full_spec(bdw.shape),
                _full_spec(w3.shape), _full_spec(b3.shape),
            ],
            out_specs=pl.BlockSpec((cmain, nc), lambda i: (0, i)),
        ),
        compiler_params=pltpu.CompilerParams(
            dimension_semantics=("parallel",),
            vmem_limit_bytes=_VMEM_LIMIT_BYTES),
        cost_estimate=_cost(flops, bytes_acc),
    )(x_flat, rc, w1, b1, wdw, bdw, w3, b3)

    main_nchw = jnp.transpose(main_flat.reshape(cmain, B, H, W), (1, 0, 2, 3))
    return jnp.concatenate([proj, main_nchw.astype(x_nchw.dtype)], axis=1)


def shufflenet_v2_unit_stride2(x_nchw, raw, *, batch_chunk=None):
    B, C, H, W = x_nchw.shape
    assert H % 2 == 0 and W % 2 == 0, "stride-2 unit expects even spatial dims"
    cin = C
    assert cin % 8 == 0, "concat split must land on an 8-sublane boundary"
    hidden = raw["m1_w"].shape[0]
    cmain = raw["m3_w"].shape[0]
    cout = cin + cmain
    Ho, Wo = H // 2, W // 2
    spatial = Ho * Wo
    if batch_chunk is None:
        per_lane = 16 * cin + 4 * cout + 28 * hidden + 12 * cin + 8
        bc = _pick_batch_chunk(B, spatial, per_lane)
    else:
        bc = batch_chunk
    assert B % bc == 0
    nc = bc * spatial
    assert nc % 128 == 0 or bc == B, "lane width must be 128-aligned or span the batch"
    roll_like_jnp = _roll_matches_jnp()

    # NCHW -> bf16 phase layout (2, 2, C, B*Ho*Wo); one fused XLA transpose (the
    # unavoidable NCHW -> lane-dense glue), no padding, no per-phase padded copies.
    xt = jnp.transpose(x_nchw, (1, 0, 2, 3)).reshape(cin, B, Ho, 2, Wo, 2)
    xph = jnp.transpose(xt, (3, 5, 0, 1, 2, 4)).reshape(2, 2, cin, B * spatial)
    xph = xph.astype(jnp.bfloat16)

    wdwp, bdwp = _fold_dw(raw["p1_w"], raw["p1_scale"], raw["p1_shift"])
    wp1, bp1 = _fold_1x1(raw["p2_w"], raw["p2_scale"], raw["p2_shift"])
    w1, b1 = _fold_1x1(raw["m1_w"], raw["m1_scale"], raw["m1_shift"])
    wdwm, bdwm = _fold_dw(raw["m2_w"], raw["m2_scale"], raw["m2_shift"])
    w3, b3 = _fold_1x1(raw["m3_w"], raw["m3_scale"], raw["m3_shift"])
    rc = _rowcol_index(Ho, Wo, bc)
    weights = (wdwp, bdwp, wp1, bp1, w1, b1, wdwm, bdwm, w3, b3)

    flops = 2 * B * spatial * (4 * cin * hidden + 9 * hidden + hidden * cmain
                               + 9 * cin + cin * cin)
    bytes_acc = (2 * B * spatial * (4 * cin + cout) + 8 * nc
                 + sum(int(np.prod(wt.shape)) * wt.dtype.itemsize for wt in weights))

    kernel = functools.partial(_unit_s2_kernel, out_w=Wo, cin=cin,
                               roll_like_jnp=roll_like_jnp)
    out_flat = pl.pallas_call(
        kernel,
        out_shape=jax.ShapeDtypeStruct((cout, B * spatial), jnp.bfloat16),
        grid_spec=pltpu.PrefetchScalarGridSpec(
            num_scalar_prefetch=0,
            grid=(B // bc,),
            in_specs=(
                [pl.BlockSpec((2, 2, cin, nc), lambda i: (0, 0, 0, i)),
                 _full_spec(rc.shape)]
                + [_full_spec(wt.shape) for wt in weights]
            ),
            out_specs=pl.BlockSpec((cout, nc), lambda i: (0, i)),
        ),
        compiler_params=pltpu.CompilerParams(
            dimension_semantics=("parallel",),
            vmem_limit_bytes=_VMEM_LIMIT_BYTES),
        cost_estimate=_cost(flops, bytes_acc),
    )(xph, rc, *weights)

    out = jnp.transpose(out_flat.reshape(cout, B, Ho, Wo), (1, 0, 2, 3))
    return out.astype(x_nchw.dtype)


# -----------------------------------------------------------------------------
# Deterministic synthetic parameters (shapes from the module __init__).
# -----------------------------------------------------------------------------
def init_raw_params(key, in_channels, out_channels, stride, eps=1e-5):
    hidden = out_channels // 2
    out_main = out_channels - in_channels
    kit = iter(jax.random.split(key, 16))

    def conv(shape, fan_in):
        return jax.random.normal(next(kit), shape, jnp.float32) / jnp.sqrt(float(fan_in))

    def bn(c):
        gamma = 1.0 + 0.1 * jax.random.normal(next(kit), (c,), jnp.float32)
        beta = 0.1 * jax.random.normal(next(kit), (c,), jnp.float32)
        scale = gamma / jnp.sqrt(1.0 + eps)   # running_var = 1, running_mean = 0
        return scale, beta

    raw = {"m1_w": conv((hidden, in_channels), in_channels)}
    raw["m1_scale"], raw["m1_shift"] = bn(hidden)
    raw["m2_w"] = conv((hidden, 1, 3, 3), 9)
    raw["m2_scale"], raw["m2_shift"] = bn(hidden)
    raw["m3_w"] = conv((out_main, hidden), hidden)
    raw["m3_scale"], raw["m3_shift"] = bn(out_main)
    if stride == 2:
        raw["p1_w"] = conv((in_channels, 1, 3, 3), 9)
        raw["p1_scale"], raw["p1_shift"] = bn(in_channels)
        raw["p2_w"] = conv((in_channels, in_channels), in_channels)
        raw["p2_scale"], raw["p2_shift"] = bn(in_channels)
    return raw


def ref_unit(x, raw, stride):
    """Pure-JAX (XLA conv) reference mirroring the PyTorch forward (eval-mode BN)."""
    dn = ("NCHW", "OIHW", "NCHW")
    hi = lax.Precision.HIGHEST

    def conv1x1(z, w):
        return lax.conv_general_dilated(z, w[:, :, None, None], (1, 1), "VALID",
                                        dimension_numbers=dn, precision=hi)

    def dwconv(z, w, s):
        return lax.conv_general_dilated(z, w, (s, s), ((1, 1), (1, 1)),
                                        feature_group_count=z.shape[1],
                                        dimension_numbers=dn, precision=hi)

    def bn(z, scale, shift):
        return z * scale[None, :, None, None] + shift[None, :, None, None]

    relu = lambda z: jnp.maximum(z, 0.0)

    def branch_main(z):
        z = relu(bn(conv1x1(z, raw["m1_w"]), raw["m1_scale"], raw["m1_shift"]))
        z = bn(dwconv(z, raw["m2_w"], stride), raw["m2_scale"], raw["m2_shift"])
        z = relu(bn(conv1x1(z, raw["m3_w"]), raw["m3_scale"], raw["m3_shift"]))
        return z

    if stride == 1:
        proj, main_in = channel_shuffle(x)
        return jnp.concatenate([proj, branch_main(main_in)], axis=1)
    p = bn(dwconv(x, raw["p1_w"], 2), raw["p1_scale"], raw["p1_shift"])
    p = relu(bn(conv1x1(p, raw["p2_w"]), raw["p2_scale"], raw["p2_shift"]))
    return jnp.concatenate([p, branch_main(x)], axis=1)


if __name__ == "__main__":
    key = jax.random.PRNGKey(0)
    kx1, kx2, kp1, kp2 = jax.random.split(key, 4)

    # bf16 activations / weights / outputs -> ~1e-2-level relative error budget.
    RTOL = ATOL = 2e-2

    # stride = 1: in_channels=8, out_channels=16 (module input carries 2*in_channels).
    raw1 = init_raw_params(kp1, 8, 16, 1)
    x1 = jax.random.normal(kx1, (2, 16, 16, 16), jnp.float32)   # NCHW
    out1 = jax.block_until_ready(shufflenet_v2_unit_stride1(x1, raw1))
    ref1 = ref_unit(x1, raw1, 1)
    assert out1.shape == (2, 16, 16, 16)
    np.testing.assert_allclose(np.asarray(out1), np.asarray(ref1), rtol=RTOL, atol=ATOL)

    # stride = 2: in_channels=8, out_channels=24 (module input carries in_channels).
    raw2 = init_raw_params(kp2, 8, 24, 2)
    x2 = jax.random.normal(kx2, (2, 8, 16, 16), jnp.float32)    # NCHW
    out2 = jax.block_until_ready(shufflenet_v2_unit_stride2(x2, raw2))
    ref2 = ref_unit(x2, raw2, 2)
    assert out2.shape == (2, 24, 8, 8)
    np.testing.assert_allclose(np.asarray(out2), np.asarray(ref2), rtol=RTOL, atol=ATOL)

    print("KERNEL_OK")
</pallas_src>

<mosaic_0001>
module attributes {stable_mosaic.version = 11 : i64} {
  func.func @k(%arg0: memref<8x128xf32, #tpu.memory_space<vmem>>, %arg1: memref<8x128xf32, #tpu.memory_space<vmem>>) attributes {dimension_semantics = [], scalar_prefetch = 0 : i64, scratch_operands = 0 : i64, tpu.core_type = #tpu.core_type<tc>} {
    %c0 = arith.constant 0 : index
    %c0_0 = arith.constant 0 : index
    %0 = vector.load %arg0[%c0, %c0_0] : memref<8x128xf32, #tpu.memory_space<vmem>>, vector<8x128xf32>
    %c1_i32 = arith.constant 1 : i32
    %1 = tpu.dynamic_rotate %0 by %c1_i32 dim 1 : vector<8x128xf32>, i32 -> vector<8x128xf32>
    %c0_1 = arith.constant 0 : index
    %c0_2 = arith.constant 0 : index
    %2 = vector.load %arg1[%c0_1, %c0_2] : memref<8x128xf32, #tpu.memory_space<vmem>>, vector<8x128xf32>
    tpu.vector_store %arg1[%c0_1, %c0_2], %1 {strides = array<i32>} : memref<8x128xf32, #tpu.memory_space<vmem>>, vector<8x128xf32>,
    return
  }
}

</mosaic_0001>

<bundles_post_ra>
// kernel: tpu_custom_call.1
= control target key start
LH: loop header
LB: loop body
LE: loop exit
PB: predicated region body
PF: predicated region fallthrough
CT: control target
= control target key end

     0   :  { %6 = vsyncpa [#allocation3], 0  ;;  %s128_s0 = inlined_call_operand.hbm [shape: f32[8,128], index: 0, kind: input, shape index: {}]   ;;  %s129_s1 = inlined_call_operand.hbm [shape: f32[8,128], index: 1, kind: output, shape index: {}]  }
   0x1   :  { %7 = vsyncpa [#allocation4], 0  ;;  %s91_s6 = smov [#allocation2]   ;;  %s43_s10 = scalar_lea.hbm %s128_s0, 128 }
   0x2   :  { %s14_s7 = sshll.u32 %s91_s6, 4  ;;  %p44_p0 = scmp.ne.s32.totalorder %s128_s0, %s43_s10  ;;  %s15_s7 = int_to_ptr.vmem [resolvable:$true] %s14_s7 }
   0x3   :  { %p47_p1 = scmp.lt.u32.totalorder %s43_s10, %s128_s0 }
   0x5   :  { %p49_p2 = pnand %p47_p1, %p44_p0 }
   0x7   :  { %52 = shalt.err (!%p49_p2)
}
   0x8   :  { %s53_s15 = scalar_lea.vmem %s15_s7, 128  ;;  %p58_p4 = scmp.lt.s32.totalorder %s15_s7, %s15_s7 }
   0x9   :  { %p54_p3 = scmp.ne.s32.totalorder %s15_s7, %s53_s15  ;;  %p59_p5 = scmp.lt.s32.totalorder %s53_s15, %s53_s15 }
   0xb   :  { %p60_p6 = por %p59_p5, %p58_p4 }
   0xd   :  { %p61_p7 = pnand %p60_p6, %p54_p3 }
   0xf   :  { %64 = shalt.err (!%p61_p7)
}
  0x10   :  { %17 = dma.hbm_to_vmem [thread:$0]  %s128_s0, 128, %s15_s7, [#allocation3]  }
  0x11   :  { %87 = dma.done.wait [#allocation3], 128  }
  0x12   :  { %88 = vsyncadd [#allocation3], 4294967168  ;;  %v21_v0 = vld [vmem:[#allocation2] sm:$0xff]  ;;  %s92_s18 = smov 1   ;;  %s93_s19 = smov [#allocation5]  }
  0x13   :  { %22 = vrot.lane.b32.xlu0 %v21_v0, %s92_s18  ;;  %s31_s20 = sshll.u32 %s93_s19, 4  ;;  %s32_s20 = int_to_ptr.vmem [resolvable:$true] %s31_s20 }
  0x14   :  { %s65_s21 = scalar_lea.vmem %s32_s20, 128  ;;  %p70_p9 = scmp.lt.s32.totalorder %s32_s20, %s32_s20 }
  0x15   :  { %p66_p8 = scmp.ne.s32.totalorder %s32_s20, %s65_s21  ;;  %p71_p10 = scmp.lt.s32.totalorder %s65_s21, %s65_s21 }
  0x17   :  { %p72_p11 = por %p71_p10, %p70_p9 }
  0x19   :  { %p73_p12 = pnand %p72_p11, %p66_p8 }
  0x85   :  { %v23_v1 = vpop.permute.xlu0 %22 }
  0x86   :  { %24 = vst [vmem:[#allocation5] sm:$0xff] %v23_v1 }
  0x87   :  { %76 = shalt.err (!%p73_p12)
}
  0x88   :  { %s77_s0 = scalar_lea.hbm %s129_s1, 128 }
  0x89   :  { %p78_p13 = scmp.ne.s32.totalorder %s129_s1, %s77_s0  ;;  %p81_p0 = scmp.lt.u32.totalorder %s77_s0, %s129_s1 }
  0x8b   :  { %p83_p1 = pnand %p81_p0, %p78_p13 }
  0x8d   :  { %86 = shalt.err (!%p83_p1)
}
  0x8e   :  { %34 = dma.vmem_to_hbm [thread:$0]  %s32_s20, 128, %s129_s1, [#allocation4]  }
  0x8f   :  { %89 = dma.done.wait [#allocation4], 128  }
  0x90   :  { %90 = vsyncadd [#allocation4], 4294967168 }
  0x91   :  { %38 = vsyncpa [#allocation3], 1 }
  0x92   :  { %39 = vsyncpa [#allocation4], 1 }

</bundles_post_ra>
